<compile_context>
chip_gen: v6e
topology: v6e:2x2x1
jax: 0.10.0
libtpu: 0.0.40
codegen_flags: <defaults>
</compile_context>

<pallas_src>
import functools

import jax
import jax.numpy as jnp
from jax.experimental import pallas as pl
from jax.experimental.pallas import tpu as pltpu


def _round_up(x, m):
    return ((x + m - 1) // m) * m


# ----------------------------------------------------------------------------
# Kernel 1: fused projection heads, grid=(M,)  — one modality per grid step
# ----------------------------------------------------------------------------
def _projection_kernel(x_ref, w1_ref, b1_ref, gamma_ref, beta_ref, w2_ref, b2_ref,
                       proj_ref, norm_ref):
    x = x_ref[...]                                     # (B, Dpad) f32, zero-padded K
    # Linear 1 — bf16 MXU operands, f32 accumulation.
    h = jnp.dot(x.astype(jnp.bfloat16), w1_ref[...].astype(jnp.bfloat16),
                preferred_element_type=jnp.float32) + b1_ref[...]
    # BatchNorm1d, training mode: single-pass batch stats (biased var), eps = 1e-5.
    inv_b = jnp.float32(1.0 / h.shape[0])
    mean = jnp.sum(h, axis=0, keepdims=True) * inv_b
    mean_sq = jnp.sum(h * h, axis=0, keepdims=True) * inv_b
    var = jnp.maximum(mean_sq - mean * mean, 0.0)
    h = (h - mean) * jax.lax.rsqrt(var + 1e-5) * gamma_ref[...] + beta_ref[...]
    # ReLU
    h = jnp.maximum(h, 0.0)
    # Linear 2 — bf16 MXU operands, f32 accumulation.
    p = jnp.dot(h.astype(jnp.bfloat16), w2_ref[...].astype(jnp.bfloat16),
                preferred_element_type=jnp.float32) + b2_ref[...]
    proj_ref[...] = p
    # F.normalize(p, dim=1):  p / max(||p||, 1e-12)  ==  p * rsqrt(max(||p||^2, 1e-24))
    sumsq = jnp.sum(p * p, axis=1, keepdims=True)
    norm_ref[...] = p * jax.lax.rsqrt(jnp.maximum(sumsq, 1e-24))


def fused_projection_heads(x_stack, w1, b1, gamma, beta, w2, b2):
    """x_stack: [M, B, Dpad] -> (proj [M, B, P], normed [M, B, P])."""
    M, B, d_pad = x_stack.shape
    H = w1.shape[-1]
    P = w2.shape[-1]
    head = lambda m: (m, 0, 0)
    return pl.pallas_call(
        _projection_kernel,
        grid=(M,),
        in_specs=[
            pl.BlockSpec((None, B, d_pad), head),   # x
            pl.BlockSpec((None, d_pad, H), head),   # W1
            pl.BlockSpec((None, 1, H), head),       # b1
            pl.BlockSpec((None, 1, H), head),       # gamma
            pl.BlockSpec((None, 1, H), head),       # beta
            pl.BlockSpec((None, H, P), head),       # W2
            pl.BlockSpec((None, 1, P), head),       # b2
        ],
        out_specs=(pl.BlockSpec((None, B, P), head),
                   pl.BlockSpec((None, B, P), head)),
        out_shape=(jax.ShapeDtypeStruct((M, B, P), jnp.float32),
                   jax.ShapeDtypeStruct((M, B, P), jnp.float32)),
        compiler_params=pltpu.CompilerParams(
            dimension_semantics=("parallel",)),
    )(x_stack, w1, b1, gamma, beta, w2, b2)


# ----------------------------------------------------------------------------
# Kernel 2: cross-modal contrastive loss over pre-normalized projections [M, B, P]
# ----------------------------------------------------------------------------
def _contrastive_kernel(n_ref, o_ref, *, num_modalities, temperature, base_temperature):
    inv_t = jnp.float32(1.0 / temperature)
    # bf16 copies feed the MXU; f32 kept for elementwise math.
    normed_bf = [n_ref[m].astype(jnp.bfloat16) for m in range(num_modalities)]

    total = jnp.float32(0.0)
    for i in range(num_modalities):
        for j in range(i + 1, num_modalities):
            ni, nj = normed_bf[i], normed_bf[j]
            # anchor @ contrast.T without an explicit transpose: contract dim 1 vs dim 1.
            sim = jax.lax.dot_general(
                ni, nj, (((1,), (1,)), ((), ())),
                preferred_element_type=jnp.float32) * inv_t           # (B, B)
            # Diagonal positives computed directly (== sim[k, k]); no BxB eye mask.
            diag = jnp.sum(ni.astype(jnp.float32) * nj.astype(jnp.float32),
                           axis=1, keepdims=True) * inv_t             # (B, 1)
            # i -> j direction: row-wise logsumexp (max-subtracted, matches PyTorch).
            row_max = jnp.max(sim, axis=1, keepdims=True)
            lse_row = row_max + jnp.log(
                jnp.sum(jnp.exp(sim - row_max), axis=1, keepdims=True))   # (B, 1)
            # j -> i direction: column-wise logsumexp — no BxB transpose.
            col_max = jnp.max(sim, axis=0, keepdims=True)
            lse_col = col_max + jnp.log(
                jnp.sum(jnp.exp(sim - col_max), axis=0, keepdims=True))   # (1, B)
            # mean(lse - diag) over rows/cols; mean is linear so split it.
            loss_pair = 0.5 * (jnp.mean(lse_row) + jnp.mean(lse_col)) - jnp.mean(diag)
            total = total + loss_pair

    num_pairs = num_modalities * (num_modalities - 1) // 2
    o_ref[0, 0] = total / num_pairs * jnp.float32(temperature / base_temperature)


def contrastive_loss(normed_stack, temperature=0.07, base_temperature=0.07):
    """normed_stack: [M, B, P] L2-normalized projections -> scalar loss."""
    M = normed_stack.shape[0]
    kernel = functools.partial(
        _contrastive_kernel,
        num_modalities=M,
        temperature=float(temperature),
        base_temperature=float(base_temperature),
    )
    out = pl.pallas_call(
        kernel,
        out_shape=jax.ShapeDtypeStruct((1, 1), jnp.float32),
        in_specs=[pl.BlockSpec(memory_space=pltpu.MemorySpace.VMEM)],
        out_specs=pl.BlockSpec(memory_space=pltpu.MemorySpace.SMEM),
    )(normed_stack)
    return out[0, 0]


# ----------------------------------------------------------------------------
# Module wrapper (glue in plain JAX)
# ----------------------------------------------------------------------------
def init_modal_alignment_params(key, input_dims, projection_dim=128):
    """Stacked, K-padded parameters for the fused projection kernel."""
    M = len(input_dims)
    H = projection_dim * 2
    d_pad = _round_up(max(input_dims), 128)
    w1 = jnp.zeros((M, d_pad, H), jnp.float32)
    b1 = jnp.zeros((M, 1, H), jnp.float32)
    gamma = jnp.ones((M, 1, H), jnp.float32)
    beta = jnp.zeros((M, 1, H), jnp.float32)
    w2 = jnp.zeros((M, H, projection_dim), jnp.float32)
    b2 = jnp.zeros((M, 1, projection_dim), jnp.float32)
    for m, dim in enumerate(input_dims):
        key, k1, k2, k3, k4 = jax.random.split(key, 5)
        w1 = w1.at[m, :dim, :].set(jax.random.normal(k1, (dim, H), jnp.float32) * 0.05)
        b1 = b1.at[m].set(jax.random.normal(k2, (1, H), jnp.float32) * 0.01)
        w2 = w2.at[m].set(jax.random.normal(k3, (H, projection_dim), jnp.float32) * 0.05)
        b2 = b2.at[m].set(jax.random.normal(k4, (1, projection_dim), jnp.float32) * 0.01)
    return dict(w1=w1, b1=b1, gamma=gamma, beta=beta, w2=w2, b2=b2,
                input_dims=tuple(input_dims), d_pad=d_pad,
                projection_dim=projection_dim)


def modal_alignment_forward(params, features_list, temperature=0.07):
    d_pad = params["d_pad"]
    # Zero-pad each modality's feature dim to d_pad and stack -> [M, B, d_pad].
    x_stack = jnp.stack(
        [jnp.pad(x.astype(jnp.float32), ((0, 0), (0, d_pad - x.shape[1])))
         for x in features_list], axis=0)
    proj, normed = fused_projection_heads(
        x_stack, params["w1"], params["b1"], params["gamma"], params["beta"],
        params["w2"], params["b2"])
    loss = contrastive_loss(normed, temperature=temperature, base_temperature=0.07)
    projected = [proj[m] for m in range(proj.shape[0])]
    return projected, loss


if __name__ == "__main__":
    key = jax.random.PRNGKey(0)

    batch = 8
    projection_dim = 128
    input_dims = [32, 48, 64]          # three modalities with different feature dims

    key, kp = jax.random.split(key)
    params = init_modal_alignment_params(kp, input_dims, projection_dim)

    feats = []
    for d in input_dims:
        key, kf = jax.random.split(key)
        feats.append(jax.random.normal(kf, (batch, d), jnp.float32))

    projected, loss = modal_alignment_forward(params, feats, temperature=0.07)
    jax.block_until_ready(loss)
    for p in projected:
        jax.block_until_ready(p)

    assert loss.shape == ()
    assert all(p.shape == (batch, projection_dim) for p in projected)
    assert bool(jnp.isfinite(loss))

    print("KERNEL_OK")
</pallas_src>

<mosaic_0001>
module attributes {stable_mosaic.version = 11 : i64} {
  func.func @_projection_kernel(%arg0: i32, %arg1: memref<1x8x128xf32, #tpu.memory_space<vmem>>, %arg2: memref<1x128x256xf32, #tpu.memory_space<vmem>>, %arg3: memref<1x1x256xf32, #tpu.memory_space<vmem>>, %arg4: memref<1x1x256xf32, #tpu.memory_space<vmem>>, %arg5: memref<1x1x256xf32, #tpu.memory_space<vmem>>, %arg6: memref<1x256x128xf32, #tpu.memory_space<vmem>>, %arg7: memref<1x1x128xf32, #tpu.memory_space<vmem>>, %arg8: memref<1x8x128xf32, #tpu.memory_space<vmem>>, %arg9: memref<1x8x128xf32, #tpu.memory_space<vmem>>) attributes {dimension_semantics = [#tpu.dimension_semantics<parallel>], iteration_bounds = array<i64: 3>, scalar_prefetch = 0 : i64, scratch_operands = 0 : i64, tpu.core_type = #tpu.core_type<tc>, window_params = [{transform_indices = @transform_0, window_bounds = array<i64: 1, 8, 128>}, {transform_indices = @transform_1, window_bounds = array<i64: 1, 128, 256>}, {transform_indices = @transform_2, window_bounds = array<i64: 1, 1, 256>}, {transform_indices = @transform_3, window_bounds = array<i64: 1, 1, 256>}, {transform_indices = @transform_4, window_bounds = array<i64: 1, 1, 256>}, {transform_indices = @transform_5, window_bounds = array<i64: 1, 256, 128>}, {transform_indices = @transform_6, window_bounds = array<i64: 1, 1, 128>}, {transform_indices = @transform_7, window_bounds = array<i64: 1, 8, 128>}, {transform_indices = @transform_8, window_bounds = array<i64: 1, 8, 128>}]} {
    %c0 = arith.constant 0 : index
    %c0_0 = arith.constant 0 : index
    %c0_1 = arith.constant 0 : index
    %0 = vector.load %arg1[%c0, %c0_0, %c0_1] : memref<1x8x128xf32, #tpu.memory_space<vmem>>, vector<1x8x128xf32>
    %1 = vector.shape_cast %0 : vector<1x8x128xf32> to vector<8x128xf32>
    %2 = arith.truncf %1 : vector<8x128xf32> to vector<8x128xbf16>
    %c0_2 = arith.constant 0 : index
    %c0_3 = arith.constant 0 : index
    %c0_4 = arith.constant 0 : index
    %3 = vector.load %arg2[%c0_2, %c0_3, %c0_4] : memref<1x128x256xf32, #tpu.memory_space<vmem>>, vector<1x128x256xf32>
    %4 = vector.shape_cast %3 : vector<1x128x256xf32> to vector<128x256xf32>
    %5 = arith.truncf %4 : vector<128x256xf32> to vector<128x256xbf16>
    %cst = arith.constant dense<0.000000e+00> : vector<8x256xf32>
    %6 = tpu.matmul %2, %5, %cst {dimension_numbers = #tpu.dot_dimension_numbers<[1], [0], [0], [1], [0, 0, 1, 1], [], []>} : vector<8x128xbf16>, vector<128x256xbf16>, vector<8x256xf32> -> vector<8x256xf32>
    %c0_5 = arith.constant 0 : index
    %c0_6 = arith.constant 0 : index
    %c0_7 = arith.constant 0 : index
    %7 = vector.load %arg3[%c0_5, %c0_6, %c0_7] : memref<1x1x256xf32, #tpu.memory_space<vmem>>, vector<1x1x256xf32>
    %8 = vector.shape_cast %7 : vector<1x1x256xf32> to vector<1x256xf32>
    %9 = vector.broadcast %8 : vector<1x256xf32> to vector<8x256xf32>
    %10 = arith.addf %6, %9 : vector<8x256xf32>
    %cst_8 = arith.constant dense<0.000000e+00> : vector<256xf32>
    %11 = vector.multi_reduction <add>, %10, %cst_8 [0] : vector<8x256xf32> to vector<256xf32>
    %12 = vector.shape_cast %11 : vector<256xf32> to vector<1x256xf32>
    %cst_9 = arith.constant 1.250000e-01 : f32
    %13 = vector.broadcast %cst_9 : f32 to vector<1x256xf32>
    %14 = arith.mulf %12, %13 : vector<1x256xf32>
    %15 = arith.mulf %10, %10 : vector<8x256xf32>
    %cst_10 = arith.constant dense<0.000000e+00> : vector<256xf32>
    %16 = vector.multi_reduction <add>, %15, %cst_10 [0] : vector<8x256xf32> to vector<256xf32>
    %17 = vector.shape_cast %16 : vector<256xf32> to vector<1x256xf32>
    %cst_11 = arith.constant 1.250000e-01 : f32
    %18 = vector.broadcast %cst_11 : f32 to vector<1x256xf32>
    %19 = arith.mulf %17, %18 : vector<1x256xf32>
    %20 = arith.mulf %14, %14 : vector<1x256xf32>
    %21 = arith.subf %19, %20 : vector<1x256xf32>
    %cst_12 = arith.constant 0.000000e+00 : f32
    %22 = vector.broadcast %cst_12 : f32 to vector<1x256xf32>
    %23 = arith.maximumf %21, %22 : vector<1x256xf32>
    %24 = vector.broadcast %14 : vector<1x256xf32> to vector<8x256xf32>
    %25 = arith.subf %10, %24 : vector<8x256xf32>
    %cst_13 = arith.constant 9.99999974E-6 : f32
    %26 = vector.broadcast %cst_13 : f32 to vector<1x256xf32>
    %27 = arith.addf %23, %26 : vector<1x256xf32>
    %28 = math.rsqrt %27 : vector<1x256xf32>
    %29 = vector.broadcast %28 : vector<1x256xf32> to vector<8x256xf32>
    %30 = arith.mulf %25, %29 : vector<8x256xf32>
    %c0_14 = arith.constant 0 : index
    %c0_15 = arith.constant 0 : index
    %c0_16 = arith.constant 0 : index
    %31 = vector.load %arg4[%c0_14, %c0_15, %c0_16] : memref<1x1x256xf32, #tpu.memory_space<vmem>>, vector<1x1x256xf32>
    %32 = vector.shape_cast %31 : vector<1x1x256xf32> to vector<1x256xf32>
    %33 = vector.broadcast %32 : vector<1x256xf32> to vector<8x256xf32>
    %34 = arith.mulf %30, %33 : vector<8x256xf32>
    %c0_17 = arith.constant 0 : index
    %c0_18 = arith.constant 0 : index
    %c0_19 = arith.constant 0 : index
    %35 = vector.load %arg5[%c0_17, %c0_18, %c0_19] : memref<1x1x256xf32, #tpu.memory_space<vmem>>, vector<1x1x256xf32>
    %36 = vector.shape_cast %35 : vector<1x1x256xf32> to vector<1x256xf32>
    %37 = vector.broadcast %36 : vector<1x256xf32> to vector<8x256xf32>
    %38 = arith.addf %34, %37 : vector<8x256xf32>
    %cst_20 = arith.constant 0.000000e+00 : f32
    %39 = vector.broadcast %cst_20 : f32 to vector<8x256xf32>
    %40 = arith.maximumf %38, %39 : vector<8x256xf32>
    %41 = arith.truncf %40 : vector<8x256xf32> to vector<8x256xbf16>
    %c0_21 = arith.constant 0 : index
    %c0_22 = arith.constant 0 : index
    %c0_23 = arith.constant 0 : index
    %42 = vector.load %arg6[%c0_21, %c0_22, %c0_23] : memref<1x256x128xf32, #tpu.memory_space<vmem>>, vector<1x256x128xf32>
    %43 = vector.shape_cast %42 : vector<1x256x128xf32> to vector<256x128xf32>
    %44 = arith.truncf %43 : vector<256x128xf32> to vector<256x128xbf16>
    %cst_24 = arith.constant dense<0.000000e+00> : vector<8x128xf32>
    %45 = tpu.matmul %41, %44, %cst_24 {dimension_numbers = #tpu.dot_dimension_numbers<[1], [0], [0], [1], [0, 0, 1, 1], [], []>} : vector<8x256xbf16>, vector<256x128xbf16>, vector<8x128xf32> -> vector<8x128xf32>
    %c0_25 = arith.constant 0 : index
    %c0_26 = arith.constant 0 : index
    %c0_27 = arith.constant 0 : index
    %46 = vector.load %arg7[%c0_25, %c0_26, %c0_27] : memref<1x1x128xf32, #tpu.memory_space<vmem>>, vector<1x1x128xf32>
    %47 = vector.shape_cast %46 : vector<1x1x128xf32> to vector<1x128xf32>
    %48 = vector.broadcast %47 : vector<1x128xf32> to vector<8x128xf32>
    %49 = arith.addf %45, %48 : vector<8x128xf32>
    %c0_28 = arith.constant 0 : index
    %c0_29 = arith.constant 0 : index
    %c0_30 = arith.constant 0 : index
    %50 = vector.load %arg8[%c0_28, %c0_29, %c0_30] : memref<1x8x128xf32, #tpu.memory_space<vmem>>, vector<1x8x128xf32>
    %51 = vector.shape_cast %50 : vector<1x8x128xf32> to vector<8x128xf32>
    %52 = vector.shape_cast %49 : vector<8x128xf32> to vector<1x8x128xf32>
    tpu.vector_store %arg8[%c0_28, %c0_29, %c0_30], %52 {strides = array<i32>} : memref<1x8x128xf32, #tpu.memory_space<vmem>>, vector<1x8x128xf32>,
    %53 = arith.mulf %49, %49 : vector<8x128xf32>
    %cst_31 = arith.constant dense<0.000000e+00> : vector<8xf32>
    %54 = vector.multi_reduction <add>, %53, %cst_31 [1] : vector<8x128xf32> to vector<8xf32>
    %55 = vector.shape_cast %54 : vector<8xf32> to vector<8x1xf32>
    %cst_32 = arith.constant 1.000000e-24 : f32
    %56 = vector.broadcast %cst_32 : f32 to vector<8x1xf32>
    %57 = arith.maximumf %55, %56 : vector<8x1xf32>
    %58 = math.rsqrt %57 : vector<8x1xf32>
    %59 = vector.broadcast %58 : vector<8x1xf32> to vector<8x128xf32>
    %60 = arith.mulf %49, %59 : vector<8x128xf32>
    %c0_33 = arith.constant 0 : index
    %c0_34 = arith.constant 0 : index
    %c0_35 = arith.constant 0 : index
    %61 = vector.load %arg9[%c0_33, %c0_34, %c0_35] : memref<1x8x128xf32, #tpu.memory_space<vmem>>, vector<1x8x128xf32>
    %62 = vector.shape_cast %61 : vector<1x8x128xf32> to vector<8x128xf32>
    %63 = vector.shape_cast %60 : vector<8x128xf32> to vector<1x8x128xf32>
    tpu.vector_store %arg9[%c0_33, %c0_34, %c0_35], %63 {strides = array<i32>} : memref<1x8x128xf32, #tpu.memory_space<vmem>>, vector<1x8x128xf32>,
    return
  }
  func.func @transform_0(%arg0: i32) -> (i32, i32, i32) {
    %c0_i32 = arith.constant 0 : i32
    %c0_i32_0 = arith.constant 0 : i32
    %c0_i32_1 = arith.constant 0 : i32
    return %arg0, %c0_i32, %c0_i32_0 : i32, i32, i32
  }
  func.func @transform_1(%arg0: i32) -> (i32, i32, i32) {
    %c0_i32 = arith.constant 0 : i32
    %c0_i32_0 = arith.constant 0 : i32
    %c0_i32_1 = arith.constant 0 : i32
    return %arg0, %c0_i32, %c0_i32_0 : i32, i32, i32
  }
  func.func @transform_2(%arg0: i32) -> (i32, i32, i32) {
    %c0_i32 = arith.constant 0 : i32
    %c0_i32_0 = arith.constant 0 : i32
    %c0_i32_1 = arith.constant 0 : i32
    return %arg0, %c0_i32, %c0_i32_0 : i32, i32, i32
  }
  func.func @transform_3(%arg0: i32) -> (i32, i32, i32) {
    %c0_i32 = arith.constant 0 : i32
    %c0_i32_0 = arith.constant 0 : i32
    %c0_i32_1 = arith.constant 0 : i32
    return %arg0, %c0_i32, %c0_i32_0 : i32, i32, i32
  }
  func.func @transform_4(%arg0: i32) -> (i32, i32, i32) {
    %c0_i32 = arith.constant 0 : i32
    %c0_i32_0 = arith.constant 0 : i32
    %c0_i32_1 = arith.constant 0 : i32
    return %arg0, %c0_i32, %c0_i32_0 : i32, i32, i32
  }
  func.func @transform_5(%arg0: i32) -> (i32, i32, i32) {
    %c0_i32 = arith.constant 0 : i32
    %c0_i32_0 = arith.constant 0 : i32
    %c0_i32_1 = arith.constant 0 : i32
    return %arg0, %c0_i32, %c0_i32_0 : i32, i32, i32
  }
  func.func @transform_6(%arg0: i32) -> (i32, i32, i32) {
    %c0_i32 = arith.constant 0 : i32
    %c0_i32_0 = arith.constant 0 : i32
    %c0_i32_1 = arith.constant 0 : i32
    return %arg0, %c0_i32, %c0_i32_0 : i32, i32, i32
  }
  func.func @transform_7(%arg0: i32) -> (i32, i32, i32) {
    %c0_i32 = arith.constant 0 : i32
    %c0_i32_0 = arith.constant 0 : i32
    %c0_i32_1 = arith.constant 0 : i32
    return %arg0, %c0_i32, %c0_i32_0 : i32, i32, i32
  }
  func.func @transform_8(%arg0: i32) -> (i32, i32, i32) {
    %c0_i32 = arith.constant 0 : i32
    %c0_i32_0 = arith.constant 0 : i32
    %c0_i32_1 = arith.constant 0 : i32
    return %arg0, %c0_i32, %c0_i32_0 : i32, i32, i32
  }
}

</mosaic_0001>

<bundles_post_ra>
// kernel: tpu_custom_call.1
= control target key start
LH: loop header
LB: loop body
LE: loop exit
PB: predicated region body
PF: predicated region fallthrough
CT: control target
= control target key end

     0   :  { %s1889_s0 = inlined_call_operand.hbm [shape: f32[3,8,128], index: 0, kind: input, shape index: {}]   ;;  %s1890_s1 = inlined_call_operand.hbm [shape: f32[3,128,256], index: 1, kind: input, shape index: {}]   ;;  %s1891_s2 = inlined_call_operand.hbm [shape: f32[3,1,256], index: 2, kind: input, shape index: {}]   ;;  %s1892_s3 = inlined_call_operand.hbm [shape: f32[3,1,256], index: 3, kind: input, shape index: {}]   ;;  %s1893_s4 = inlined_call_operand.vmem [shape: f32[3,1,256], index: 4, kind: input, shape index: {}]   ;;  %s1894_s5 = inlined_call_operand.hbm [shape: f32[3,256,128], index: 5, kind: input, shape index: {}]   ;;  %s1895_s6 = inlined_call_operand.vmem [shape: f32[3,1,128], index: 6, kind: input, shape index: {}]   ;;  %s1896_s7 = inlined_call_operand.hbm [shape: f32[3,8,128], index: 7, kind: output, shape index: {0}]   ;;  %s1897_s8 = inlined_call_operand.hbm [shape: f32[3,8,128], index: 8, kind: output, shape index: {1}]  }
   0x1   :  { %1914 = sst [smem:[#allocation26_spill]] %s1890_s1 }
   0x2   :  { %1915 = sst [smem:[#allocation27_spill]] %s1892_s3 }
   0x3   :  { %1916 = sst [smem:[#allocation28_spill]] %s1896_s7 }
   0x4   :  { %1917 = sst [smem:[#allocation29_spill]] %s1897_s8 }
   0x5   :  { %14 = vsyncpa [#allocation3], 0 }
   0x6   :  { %16 = vsyncpa [#allocation3 + $0x1], 0 }
   0x7   :  { %17 = vsyncpa [#allocation6], 0 }
   0x8   :  { %19 = vsyncpa [#allocation6 + $0x1], 0 }
   0x9   :  { %20 = vsyncpa [#allocation9], 0 }
   0xa   :  { %22 = vsyncpa [#allocation9 + $0x1], 0 }
   0xb   :  { %23 = vsyncpa [#allocation4], 0 }
   0xc   :  { %25 = vsyncpa [#allocation4 + $0x1], 0 }
   0xd   :  { %26 = vsyncpa [#allocation13], 0 }
   0xe   :  { %28 = vsyncpa [#allocation13 + $0x1], 0  ;;  %s1479_s27 = smov 0   ;;  %s1481_s28 = smov 0  }
   0xf   :  { %s1483_s29 = smov 0   ;;  %s1485_s30 = smov 0  }
  0x10 LB: > { %1918 = sst [smem:[#allocation19_spill]] %s1408_s27  ;;  %s1500_s9 = sadd.s32 4294967295, %s1420_s30   ;;  %s1420_s30 = sphi %s1485_s30, %s1947_s30   ;;  %s1416_s29 = sphi %s1483_s29, %s1949_s29   ;;  %s1412_s28 = sphi %s1481_s28, %s1951_s28   ;;  %s1408_s27 = sphi %s1479_s27, %s1950_s27  }
  0x11   : > { %1919 = sst [smem:[#allocation20_spill]] %s1416_s29  ;;  %s1037_s10 = sadd.s32 4294967294, %s1420_s30  }
  0x12   : > { %1920 = sst [smem:[#allocation21_spill]] %s1420_s30  ;;  %s1504_s11 = sadd.s32 1, %s1420_s30  }
  0x13   : > { %1921 = sst [smem:[#allocation22_spill]] %s1504_s11  ;;  %s41_s12 = sadd.s32 1, %s1416_s29 }
  0x14   : > { %s38_s13 = ssub.s32 %s1420_s30, %s1504_s11  ;;  %p48_p0 = scmp.ne.s32.totalorder %s1416_s29, %s1412_s28 }
  0x15   : > { %p39_p1 = scmp.eq.s32.totalorder %s38_s13, 0  ;;  %p49_p2 = scmp.eq.s32.totalorder %s1420_s30, 0 }
  0x16   : > { %p54_p3 = scmp.ne.s32.totalorder %s1412_s28, %s1408_s27  ;;  %p55_p4 = scmp.eq.s32.totalorder %s1500_s9, 0 }
  0x17   : > { %s1516_s14 = scalar_select %p39_p1, %s1416_s29, %s41_s12  }
  0x18   : > { %p50_p5 = por %p49_p2, %p48_p0  ;;  %p1518_p6 = por %p55_p4, %p54_p3 }
  0x19   : > { %1922 = sst [smem:[#allocation23_spill]] %s1516_s14  ;;  %p234_p7 = scmp.eq.s32.totalorder %s1500_s9, 2 }
  0x1a   : > { %s1923_s15 = scalar_select %p1518_p6, 1, 0 }
  0x1b   : > { %p240_p8 = scmp.eq.s32.totalorder %s1037_s10, 2  ;;  %p1133_p9 = scmp.lt.s32.totalorder %s1420_s30, 3 }
  0x1c   : > { %p1524_p10 = por %p234_p7, %p48_p0  ;;  %s1533_s18 = sand.u32 1, %s1416_s29  }
  0x1d   : > { %p1528_p11 = por %p240_p8, %p54_p3  ;;  %p1535_p12 = pnand %p1133_p9, %p50_p5 }
  0x1e   : > { %s1924_s16 = scalar_select %p1524_p10, 1, 0 }
  0x1f   : > { %s1926_s17 = scalar_select %p1528_p11, 1, 0 }
  0x20   : > { %1925 = sst [smem:[#allocation24_spill]] %s1924_s16  ;;  %s1900_s20 = sand.u32 1, %s1420_s30  }
  0x21   : > { %1927 = sst [smem:[#allocation25_spill]] %s1926_s17  ;;  %s1898_s21 = sshll.u32 %s1533_s18, 8 }
  0x22   : > { %s1899_s22 = sshll.u32 %s1420_s30, 12  ;;  %s1929_s1 = sld [smem:[#allocation26_spill]] }
  0x23   : > { %s308_s26 = scalar_lea.vmem [#allocation5], %s1898_s21  ;;  %s1555_s12 = scalar_lea.sflag [#allocation6], %s1900_s20 }
  0x24   : > { %s315_s10 = sshll.u32 %s308_s26, 4  ;;  %p1561_p0 = pneg %p1535_p12  ;;  %s1551_s10 = int_to_ptr.vmem [resolvable:$true] %s315_s10 }
  0x28   : > { %s1547_s25 = scalar_lea.hbm %s1929_s1, %s1899_s22  ;;  %s1183_s26 = scalar_lea.hbm %s1929_s1, 12288 }
  0x29   : > { %s1178_s13 = scalar_lea.hbm %s1547_s25, 4096  ;;  %p1184_p3 = scmp.lt.s32.totalorder %s1547_s25, %s1929_s1 }
  0x2a   : > { %p1179_p13 = scmp.ne.s32.totalorder %s1547_s25, %s1178_s13  ;;  %p1185_p4 = scmp.lt.s32.totalorder %s1183_s26, %s1178_s13 }
  0x2c   : > { %p1181_p1 = pnand %p1561_p0, %p1179_p13  ;;  %p1186_p5 = por %p1185_p4, %p1184_p3 }
  0x2e   : > { %p1182_p2 = pneg %p1181_p1 }
  0x30   : > { %p1187_p7 = pnand %p1186_p5, %p1182_p2 }
  0x32   : > { %1190 = shalt.err (!%p1187_p7)
}
  0x33   : > { %s1191_s20 = scalar_lea.vmem %s1551_s10, 4096  ;;  %s1422_s29 = smov [#allocation5]  }
  0x34   : > { %p1192_p8 = scmp.ne.s32.totalorder %s1551_s10, %s1191_s20  ;;  %s1196_s23 = sshll.u32 %s1422_s29, 4  ;;  %s1197_s23 = int_to_ptr.vmem [resolvable:$false] %s1196_s23 }
  0x35   : > { %s1198_s24 = scalar_lea.vmem %s1197_s23, 8192  ;;  %p1199_p1 = scmp.lt.s32.totalorder %s1551_s10, %s1197_s23 }
  0x36   : > { %p1194_p9 = pnand %p1192_p8, %p1561_p0  ;;  %p1200_p11 = scmp.lt.s32.totalorder %s1198_s24, %s1191_s20 }
  0x38   : > { %p1195_p13 = pneg %p1194_p9  ;;  %p1201_p10 = por %p1200_p11, %p1199_p1 }
  0x3a   : > { %p1202_p6 = pnand %p1201_p10, %p1195_p13 }
  0x3c   : > { %1205 = shalt.err (!%p1202_p6)
}
  0x3d   : > { %s1423_s21 = smov 256   ;;  %s1424_s29 = smov 16  }
  0x3e   : > { %1116 = dma.hbm_to_vmem [thread:$0]  (!%p1535_p12), %s1547_s25, 4096, %s1551_s10, %s1555_s12, %s1423_s21, %s1423_s21, %s1424_s29  }
  0x3f   : > { %s1931_s20 = sshll.u32 %s1420_s30, 12  ;;  %s1932_s23 = sshll.u32 %s1533_s18, 8 }
  0x40   : > { %s1589_s26 = scalar_lea.hbm %s1894_s5, %s1931_s20  ;;  %s374_s24 = scalar_lea.vmem [#allocation10], %s1932_s23 }
  0x41   : > { %s381_s1 = sshll.u32 %s374_s24, 4  ;;  %p1054_p6 = scmp.ge.s32.totalorder %s1420_s30, 1  ;;  %s1593_s1 = int_to_ptr.vmem [resolvable:$true] %s381_s1 }
  0x42   : > { %p395_p10 = scmp.lt.s32.totalorder %s1420_s30, 4  ;;  %s1910_s11 = sshll.u32 %s1533_s18, 1 }
  0x43   : > { %s1071_s17 = sshll.u32 %s1420_s30, 5  ;;  %s1934_s3 = sld [smem:[#allocation27_spill]] }
  0x44   : > { %p1599_p11 = pnand %p1054_p6, %p395_p10  ;;  %s1606_s21 = scalar_lea.hbm %s1891_s2, %s1071_s17 }
  0x45   : > { %s348_s13 = scalar_lea.vmem [#allocation8], %s1910_s11  ;;  %s1935_s24 = sand.u32 1, %s1420_s30  }
  0x46   : > { %s1933_s27 = scalar_select %p1599_p11, 1, 0 }
  0x47   : > { %s356_s23 = sshll.u32 %s348_s13, 4  ;;  %s1617_s8 = scalar_lea.sflag [#allocation9], %s1935_s24  ;;  %s357_s23 = int_to_ptr.vmem [resolvable:$true] %s356_s23 }
  0x49   : > { %s1611_s22 = scalar_lea.hbm %s1934_s3, %s1071_s17  ;;  %s1211_s17 = scalar_lea.hbm %s1934_s3, 96 }
  0x4a   : > { %s1206_s7 = scalar_lea.hbm %s1611_s22, 32  ;;  %p1212_p5 = scmp.lt.s32.totalorder %s1611_s22, %s1934_s3 }
  0x4b   : > { %p1207_p2 = scmp.ne.s32.totalorder %s1611_s22, %s1206_s7  ;;  %p1213_p7 = scmp.lt.s32.totalorder %s1211_s17, %s1206_s7 }
  0x4d   : > { %p1209_p3 = pnand %p1207_p2, %p1561_p0  ;;  %p1214_p8 = por %p1213_p7, %p1212_p5 }
  0x4f   : > { %p1210_p4 = pneg %p1209_p3 }
  0x51   : > { %p1215_p9 = pnand %p1214_p8, %p1210_p4 }
  0x53   : > { %1218 = shalt.err (!%p1215_p9)
}
  0x54   : > { %s1219_s13 = scalar_lea.vmem %s357_s23, 32  ;;  %s1425_s24 = smov [#allocation8]  }
  0x55   : > { %p1220_p13 = scmp.ne.s32.totalorder %s357_s23, %s1219_s13  ;;  %s1224_s11 = sshll.u32 %s1425_s24, 4  ;;  %s1225_s11 = int_to_ptr.vmem [resolvable:$false] %s1224_s11 }
  0x56   : > { %s1226_s16 = scalar_lea.vmem %s1225_s11, 64  ;;  %p1227_p10 = scmp.lt.s32.totalorder %s357_s23, %s1225_s11 }
  0x57   : > { %p1222_p1 = pnand %p1220_p13, %p1561_p0  ;;  %p1228_p2 = scmp.lt.s32.totalorder %s1226_s16, %s1219_s13 }
  0x59   : > { %p1223_p6 = pneg %p1222_p1  ;;  %p1229_p3 = por %p1228_p2, %p1227_p10 }
  0x5b   : > { %p1230_p11 = pnand %p1229_p3, %p1223_p6 }
  0x5d   : > { %1233 = shalt.err (!%p1230_p11)
}
  0x5e   : > { %1122 = dma.hbm_to_vmem [thread:$0]  (!%p1535_p12), %s1611_s22, 32, %s357_s23, %s1617_s8  }
  0x5f   : > { %s1040_s7 = sshll.u32 %s1533_s18, 3  ;;  %s1041_s25 = sshll.u32 %s1420_s30, 7 }
  0x60   : > { %s1641_s11 = scalar_lea.hbm %s1889_s0, %s1041_s25  ;;  %s290_s16 = scalar_lea.vmem [#allocation2], %s1040_s7 }
  0x61   : > { %s297_s29 = sshll.u32 %s290_s16, 4  ;;  %s1936_s20 = sshll.u32 %s1533_s18, 1  ;;  %s298_s29 = int_to_ptr.vmem [resolvable:$true] %s297_s29 }
  0x62   : > { %s329_s13 = scalar_lea.vmem [#allocation7], %s1936_s20  ;;  %s287_s3 = scalar_lea.sflag [#allocation3], %s1533_s18 }
  0x63   : > { %s337_s24 = sshll.u32 %s329_s13, 4  ;;  %s1234_s22 = scalar_lea.hbm %s1641_s11, 128  ;;  %s1645_s24 = int_to_ptr.vmem [resolvable:$true] %s337_s24 }
  0x64   : > { %p1235_p11 = scmp.ne.s32.totalorder %s1641_s11, %s1234_s22  ;;  %s1239_s10 = scalar_lea.hbm %s1889_s0, 384 }
  0x65   : > { %p1240_p7 = scmp.lt.s32.totalorder %s1641_s11, %s1889_s0  ;;  %p1241_p8 = scmp.lt.s32.totalorder %s1239_s10, %s1234_s22 }
  0x66   : > { %p1237_p4 = pnand %p1235_p11, %p1561_p0 }
  0x67   : > { %p1242_p9 = por %p1241_p8, %p1240_p7 }
  0x68   : > { %p1238_p5 = pneg %p1237_p4 }
  0x6a   : > { %p1243_p13 = pnand %p1242_p9, %p1238_p5 }
  0x6c   : > { %1246 = shalt.err (!%p1243_p13)
}
  0x6d   : > { %s1247_s7 = scalar_lea.vmem %s298_s29, 128  ;;  %s1426_s18 = smov [#allocation2]  }
  0x6e   : > { %p1248_p1 = scmp.ne.s32.totalorder %s298_s29, %s1247_s7  ;;  %s1252_s16 = sshll.u32 %s1426_s18, 4  ;;  %s1253_s16 = int_to_ptr.vmem [resolvable:$false] %s1252_s16 }
  0x6f   : > { %s1254_s20 = scalar_lea.vmem %s1253_s16, 256  ;;  %p1255_p2 = scmp.lt.s32.totalorder %s298_s29, %s1253_s16 }
  0x70   : > { %p1250_p6 = pnand %p1248_p1, %p1561_p0  ;;  %p1256_p3 = scmp.lt.s32.totalorder %s1254_s20, %s1247_s7 }
  0x72   : > { %p1251_p10 = pneg %p1250_p6  ;;  %p1257_p11 = por %p1256_p3, %p1255_p2 }
  0x74   : > { %p1258_p4 = pnand %p1257_p11, %p1251_p10 }
  0x76   : > { %1261 = shalt.err (!%p1258_p4)
}
  0x77   : > { %1113 = dma.hbm_to_vmem [thread:$0]  (!%p1535_p12), %s1641_s11, 128, %s298_s29, %s287_s3  }
  0x78   : > { %s1262_s30 = scalar_lea.hbm %s1606_s21, 32  ;;  %s1267_s23 = scalar_lea.hbm %s1891_s2, 96 }
  0x79   : > { %p1263_p5 = scmp.ne.s32.totalorder %s1606_s21, %s1262_s30  ;;  %p1268_p9 = scmp.lt.s32.totalorder %s1606_s21, %s1891_s2 }
  0x7a   : > { %p1269_p13 = scmp.lt.s32.totalorder %s1267_s23, %s1262_s30 }
  0x7b   : > { %p1265_p7 = pnand %p1263_p5, %p1561_p0 }
  0x7c   : > { %p1270_p1 = por %p1269_p13, %p1268_p9 }
  0x7d   : > { %p1266_p8 = pneg %p1265_p7 }
  0x7f   : > { %p1271_p6 = pnand %p1270_p1, %p1266_p8 }
  0x81   : > { %1274 = shalt.err (!%p1271_p6)
}
  0x82   : > { %s1275_s3 = scalar_lea.vmem %s1645_s24, 32  ;;  %s1427_s11 = smov [#allocation7]  }
  0x83   : > { %p1276_p10 = scmp.ne.s32.totalorder %s1645_s24, %s1275_s3  ;;  %s1280_s29 = sshll.u32 %s1427_s11, 4  ;;  %s1281_s29 = int_to_ptr.vmem [resolvable:$false] %s1280_s29 }
  0x84   : > { %s1282_s17 = scalar_lea.vmem %s1281_s29, 64  ;;  %p1283_p11 = scmp.lt.s32.totalorder %s1645_s24, %s1281_s29 }
  0x85   : > { %p1278_p2 = pnand %p1276_p10, %p1561_p0  ;;  %p1284_p4 = scmp.lt.s32.totalorder %s1282_s17, %s1275_s3 }
  0x87   : > { %p1279_p3 = pneg %p1278_p2  ;;  %p1285_p5 = por %p1284_p4, %p1283_p11 }
  0x89   : > { %p1286_p7 = pnand %p1285_p5, %p1279_p3 }
  0x8b   : > { %1289 = shalt.err (!%p1286_p7)
}
  0x8c   : > { %1119 = dma.hbm_to_vmem [thread:$0]  (!%p1535_p12), %s1606_s21, 32, %s1645_s24, %s1555_s12  }
  0x8d   : > { %s1290_s7 = scalar_lea.hbm %s1589_s26, 4096  ;;  %s1295_s20 = scalar_lea.hbm %s1894_s5, 12288 }
  0x8e   : > { %p1291_p8 = scmp.ne.s32.totalorder %s1589_s26, %s1290_s7  ;;  %p1296_p1 = scmp.lt.s32.totalorder %s1589_s26, %s1894_s5 }
  0x8f   : > { %p1297_p6 = scmp.lt.s32.totalorder %s1295_s20, %s1290_s7 }
  0x90   : > { %p1293_p9 = pnand %p1291_p8, %p1561_p0 }
  0x91   : > { %p1298_p10 = por %p1297_p6, %p1296_p1 }
  0x92   : > { %p1294_p13 = pneg %p1293_p9 }
  0x94   : > { %p1299_p2 = pnand %p1298_p10, %p1294_p13 }
  0x96   : > { %1302 = shalt.err (!%p1299_p2)
}
  0x97   : > { %s1303_s12 = scalar_lea.vmem %s1593_s1, 4096  ;;  %s1428_s21 = smov [#allocation10]  }
  0x98   : > { %p1304_p3 = scmp.ne.s32.totalorder %s1593_s1, %s1303_s12  ;;  %s1308_s24 = sshll.u32 %s1428_s21, 4  ;;  %s1309_s24 = int_to_ptr.vmem [resolvable:$false] %s1308_s24 }
  0x99   : > { %s1310_s22 = scalar_lea.vmem %s1309_s24, 8192  ;;  %p1311_p5 = scmp.lt.s32.totalorder %s1593_s1, %s1309_s24 }
  0x9a   : > { %p1306_p11 = pnand %p1304_p3, %p1561_p0  ;;  %p1312_p7 = scmp.lt.s32.totalorder %s1310_s22, %s1303_s12 }
  0x9c   : > { %p1307_p4 = pneg %p1306_p11  ;;  %p1313_p8 = por %p1312_p7, %p1311_p5 }
  0x9e   : > { %p1314_p9 = pnand %p1313_p8, %p1307_p4 }
  0xa0   : > { %1317 = shalt.err (!%p1314_p9)
}
  0xa1   : > { %s1429_s23 = smov 128   ;;  %s1430_s25 = smov 8  }
  0xa2   : > { %1125 = dma.hbm_to_vmem [thread:$0]  (!%p1535_p12), %s1589_s26, 4096, %s1593_s1, %s1617_s8, %s1429_s23, %s1429_s23, %s1430_s25  }
  0xa3   : > { %p1937_p0 = scmp.ne.s32.totalorder %s1933_s27, 0 }
  0xa4   : > { %s1709_s14 = sand.u32 (!%p1937_p0), 1, %s1412_s28   ;;  %p1938_p13 = scmp.ne.s32.totalorder (!%p1937_p0), %s1923_s15, 0 }
  0xa5   : > { %399 = sbr.rel (%p1937_p0) target bundleno = 826 (0x33a), region = 48  ;;  %s1712_s10 = sshll.u32 (!%p1937_p0), %s1709_s14, 3 }
  0xa6   : > { %s402_s3 = scalar_lea.sflag (!%p1937_p0), [#allocation3], %s1709_s14  ;;  %s405_s11 = scalar_lea.vmem (!%p1937_p0), [#allocation2], %s1712_s10 }
  0xaa   : > { %1387 = dma.done.wait (%p1938_p13), %s402_s3, 128  }
  0xab   : > { %1389 = vsyncadd (%p1938_p13), %s402_s3, 4294967168  ;;  %s410_s1 = sand.u32 1, %s1500_s9   ;;  %s1056_s8 = sshll.u32 %s1709_s14, 8 }
  0xac   : > { %s411_s27 = scalar_lea.sflag [#allocation6], %s410_s1  ;;  %s1724_s19 = scalar_lea.vmem [#allocation5], %s1056_s8 }
  0xad   : > { %1391 = dma.done.wait (%p1938_p13), %s411_s27, 4128  }
  0xae   : > { %1393 = vsyncadd (%p1938_p13), %s411_s27, 4294963168  ;;  %s1057_s26 = sshll.u32 %s1709_s14, 1  ;;  %s429_s17 = scalar_lea.sflag [#allocation9], %s410_s1 }
  0xaf   : > { %s1731_s29 = scalar_lea.vmem [#allocation7], %s1057_s26  ;;  %s1733_s7 = scalar_lea.vmem [#allocation8], %s1057_s26 }
  0xb0   : > { %1395 = dma.done.wait (%p1938_p13), %s429_s17, 4128  }
  0xb1   : > { %1397 = vsyncadd (%p1938_p13), %s429_s17, 4294963168  ;;  %v1431_v0 = vmov 0   ;;  %v545_v1 = vld [vmem:[%s1724_s19 + $0xe8] sm:$0xff]  ;;  %v547_v2 = vld [vmem:[%s1724_s19 + $0xf8] sm:$0xff]  ;;  %s1775_s15 = scalar_lea.vmem [#allocation10], %s1056_s8  ;;  %p506_p12 = scmp.lt.s32.totalorder %s1500_s9, 2 }
  0xb2   : > { %608 = vmatprep.mubr.bf16.mxu0 %v1431_v0  ;;  %v544_v3 = vld [vmem:[%s1724_s19 + $0xe0] sm:$0xff]  ;;  %v563_v4 = vpack.c.bf16 %v547_v2, %v545_v1  ;;  %v546_v5 = vld [vmem:[%s1724_s19 + $0xf0] sm:$0xff]  ;;  %v541_v6 = vld [vmem:[%s1724_s19 + $0xc8] sm:$0xff]  ;;  %s1939_s22 = sld [smem:[#allocation24_spill]]  ;;  %s498_s23 = scalar_lea.vmem [#allocation11], %s1712_s10 }
  0xb3   : > { %v543_v7 = vld [vmem:[%s1724_s19 + $0xd8] sm:$0xff]  ;;  %v562_v8 = vpack.c.bf16 %v546_v5, %v544_v3  ;;  %v540_v10 = vld [vmem:[%s1724_s19 + $0xc0] sm:$0xff]  ;;  %v542_v11 = vld [vmem:[%s1724_s19 + $0xd0] sm:$0xff]  ;;  %s1818_s18 = scalar_select %p506_p12, %s1500_s9, 2 }
  0xb4   : > { %v561_v9 = vpack.c.bf16 %v543_v7, %v541_v6  ;;  %v537_v12 = vld [vmem:[%s1724_s19 + $0xa8] sm:$0xff]  ;;  %576 = vmatprep.subr.bf16.mxu0 %v563_v4  ;;  %v539_v13 = vld [vmem:[%s1724_s19 + $0xb8] sm:$0xff]  ;;  %v560_v14 = vpack.c.bf16 %v542_v11, %v540_v10  ;;  %v536_v16 = vld [vmem:[%s1724_s19 + $0xa0] sm:$0xff]  ;;  %s1066_s25 = sshll.u32 %s1500_s9, 7  ;;  %s1940_s1 = sld [smem:[#allocation28_spill]] }
  0xb5   : > { %577 = vmatpush1.bf16.msra.mxu0 %v562_v8  ;;  %v559_v15 = vpack.c.bf16 %v539_v13, %v537_v12  ;;  %v538_v17 = vld [vmem:[%s1724_s19 + $0xb0] sm:$0xff]  ;;  %v533_v18 = vld [vmem:[%s1724_s19 + $0x88] sm:$0xff]  ;;  %v535_v19 = vld [vmem:[%s1724_s19 + $0x98] sm:$0xff]  ;;  %s1062_s16 = sshll.u32 %s1818_s18, 1  ;;  %s512_s24 = scalar_lea.vmem %s1895_s6, %s1818_s18 }
  0xb6   : > { %578 = vmatprep.subr.bf16.mxu0 %v561_v9  ;;  %v558_v20 = vpack.c.bf16 %v538_v17, %v536_v16  ;;  %v557_v21 = vpack.c.bf16 %v535_v19, %v533_v18  ;;  %v532_v22 = vld [vmem:[%s1724_s19 + $0x80] sm:$0xff]  ;;  %v534_v23 = vld [vmem:[%s1724_s19 + $0x90] sm:$0xff]  ;;  %v529_v24 = vld [vmem:[%s1724_s19 + $0x68] sm:$0xff]  ;;  %s509_s13 = scalar_lea.vmem %s1893_s4, %s1062_s16  ;;  %s815_s27 = sshll.u32 %s498_s23, 4  ;;  %s816_s27 = int_to_ptr.vmem [resolvable:$true] %s815_s27 }
  0xb7   : > { %v531_v25 = vld [vmem:[%s1724_s19 + $0x78] sm:$0xff]  ;;  %v556_v26 = vpack.c.bf16 %v534_v23, %v532_v22  ;;  %v528_v28 = vld [vmem:[%s1724_s19 + $0x60] sm:$0xff]  ;;  %v530_v29 = vld [vmem:[%s1724_s19 + $0x70] sm:$0xff]  ;;  %s1318_s26 = scalar_lea.vmem %s816_s27, 128 }
  0xb8   : > { %v555_v27 = vpack.c.bf16 %v531_v25, %v529_v24  ;;  %v525_v30 = vld [vmem:[%s1724_s19 + $0x48] sm:$0xff]  ;;  %v527_v31 = vld [vmem:[%s1724_s19 + $0x58] sm:$0xff]  ;;  %v554_v32 = vpack.c.bf16 %v530_v29, %v528_v28  ;;  %v524_v34 = vld [vmem:[%s1724_s19 + $0x40] sm:$0xff]  ;;  %p1319_p1 = scmp.ne.s32.totalorder %s816_s27, %s1318_s26  ;;  %p1941_p6 = scmp.ne.s32.totalorder %s1939_s22, 0 }
  0xb9   : > { %579 = vmatpush1.bf16.msra.mxu0 %v560_v14  ;;  %v553_v33 = vpack.c.bf16 %v527_v31, %v525_v30  ;;  %v526_v35 = vld [vmem:[%s1724_s19 + $0x50] sm:$0xff]  ;;  %v521_v36 = vld [vmem:[%s1724_s19 + $0x28] sm:$0xff]  ;;  %v523_v37 = vld [vmem:[%s1724_s19 + $0x38] sm:$0xff] }
  0xba   : > { %580 = vmatprep.subr.bf16.mxu0 %v559_v15  ;;  %v552_v38 = vpack.c.bf16 %v526_v35, %v524_v34  ;;  %v551_v39 = vpack.c.bf16 %v523_v37, %v521_v36  ;;  %v520_v40 = vld [vmem:[%s1724_s19 + $0x20] sm:$0xff]  ;;  %v522_v41 = vld [vmem:[%s1724_s19 + $0x30] sm:$0xff]  ;;  %v517_v42 = vld [vmem:[%s1724_s19 + $0x8] sm:$0xff]  ;;  %v566_v35 = vlaneseq  ;;  %s813_s8 = scalar_lea.hbm %s1940_s1, %s1066_s25  ;;  %p1320_p10 = pnand %p1319_p1, %p1941_p6 }
  0xbb   : > { %v519_v43 = vld [vmem:[%s1724_s19 + $0x18] sm:$0xff]  ;;  %v550_v44 = vpack.c.bf16 %v522_v41, %v520_v40  ;;  %v516_v46 = vld [vmem:[%s1724_s19] sm:$0xff]  ;;  %v518_v47 = vld [vmem:[%s1724_s19 + $0x10] sm:$0xff]  ;;  %s797_s19 = scalar_lea.sflag [#allocation4], %s1709_s14 }
  0xbc   : > { %v549_v45 = vpack.c.bf16 %v519_v43, %v517_v42  ;;  %v548_v48 = vpack.c.bf16 %v518_v47, %v516_v46  ;;  %v514_v49 = vld [vmem:[%s405_s11] sm:$0xff]  ;;  %v724_v52 = vld [vmem:[%s1775_s15 + $0xf8] sm:$0xff]  ;;  %v721_v57 = vld [vmem:[%s1775_s15 + $0xe0] sm:$0xff]  ;;  %v567_v36 = vshrl.u32 %v566_v35, 7  ;;  %p1321_p2 = pneg %p1320_p10 }
  0xbd   : > { %581 = vmatpush1.bf16.msra.mxu0 %v558_v20  ;;  %v515_v50 = vpack.c.bf16 %v514_v49, %v514_v49  ;;  %v723_v51 = vld [vmem:[%s1775_s15 + $0xf0] sm:$0xff]  ;;  %v708_v55 = vld [vmem:[%s1775_s15 + $0x78] sm:$0xff]  ;;  %v722_v58 = vld [vmem:[%s1775_s15 + $0xe8] sm:$0xff] }
  0xbe   : > { %582 = vmatprep.subr.bf16.mxu0 %v557_v21  ;;  %v740_v53 = vpack.c.bf16 %v724_v52, %v723_v51  ;;  %v707_v54 = vld [vmem:[%s1775_s15 + $0x70] sm:$0xff]  ;;  %v739_v59 = vpack.c.bf16 %v722_v58, %v721_v57  ;;  %v705_v60 = vld [vmem:[%s1775_s15 + $0x60] sm:$0xff]  ;;  %v706_v61 = vld [vmem:[%s1775_s15 + $0x68] sm:$0xff]  ;;  %v1809_v37 = vsub.s32 0, %v567_v36 }
  0xbf   : > { %v732_v56 = vpack.c.bf16 %v708_v55, %v707_v54  ;;  %v731_v62 = vpack.c.bf16 %v706_v61, %v705_v60  ;;  %v719_v63 = vld [vmem:[%s1775_s15 + $0xd0] sm:$0xff]  ;;  %v720_v0 = vld [vmem:[%s1775_s15 + $0xd8] sm:$0xff]  ;;  %v717_v4 = vld [vmem:[%s1775_s15 + $0xc0] sm:$0xff] }
  0xc0   : > { %1074 = vmatprep.subr.bf16.mxu1 %v740_v53  ;;  %v703_v1 = vld [vmem:[%s1775_s15 + $0x50] sm:$0xff]  ;;  %v738_v2 = vpack.c.bf16 %v720_v0, %v719_v63  ;;  %v704_v3 = vld [vmem:[%s1775_s15 + $0x58] sm:$0xff]  ;;  %v718_v5 = vld [vmem:[%s1775_s15 + $0xc8] sm:$0xff] }
  0xc1   : > { %583 = vmatpush1.bf16.msra.mxu0 %v556_v26  ;;  %1075 = vmatpush3.bf16.msra.mxu1 %v732_v56  ;;  %v730_v6 = vpack.c.bf16 %v704_v3, %v703_v1  ;;  %v737_v7 = vpack.c.bf16 %v718_v5, %v717_v4  ;;  %v701_v8 = vld [vmem:[%s1775_s15 + $0x40] sm:$0xff]  ;;  %v702_v9 = vld [vmem:[%s1775_s15 + $0x48] sm:$0xff]  ;;  %v715_v10 = vld [vmem:[%s1775_s15 + $0xb0] sm:$0xff] }
  0xc2   : > { %584 = vmatprep.subr.bf16.mxu0 %v555_v27  ;;  %1076 = vmatprep.subr.bf16.mxu1 %v739_v59  ;;  %v716_v11 = vld [vmem:[%s1775_s15 + $0xb8] sm:$0xff]  ;;  %v729_v12 = vpack.c.bf16 %v702_v9, %v701_v8  ;;  %v699_v14 = vld [vmem:[%s1775_s15 + $0x30] sm:$0xff]  ;;  %v713_v16 = vld [vmem:[%s1775_s15 + $0xa0] sm:$0xff] }
  0xc3   : > { %v736_v13 = vpack.c.bf16 %v716_v11, %v715_v10  ;;  %v700_v15 = vld [vmem:[%s1775_s15 + $0x38] sm:$0xff]  ;;  %v714_v17 = vld [vmem:[%s1775_s15 + $0xa8] sm:$0xff]  ;;  %v697_v20 = vld [vmem:[%s1775_s15 + $0x20] sm:$0xff] }
  0xc4   : > { %v728_v18 = vpack.c.bf16 %v700_v15, %v699_v14  ;;  %v735_v19 = vpack.c.bf16 %v714_v17, %v713_v16  ;;  %v698_v21 = vld [vmem:[%s1775_s15 + $0x28] sm:$0xff]  ;;  %v711_v22 = vld [vmem:[%s1775_s15 + $0x90] sm:$0xff]  ;;  %v712_v23 = vld [vmem:[%s1775_s15 + $0x98] sm:$0xff] }
  0xc5   : > { %585 = vmatpush1.bf16.msra.mxu0 %v554_v32  ;;  %1077 = vmatpush3.bf16.msra.mxu1 %v731_v62  ;;  %v727_v24 = vpack.c.bf16 %v698_v21, %v697_v20  ;;  %v734_v25 = vpack.c.bf16 %v712_v23, %v711_v22  ;;  %v695_v26 = vld [vmem:[%s1775_s15 + $0x10] sm:$0xff]  ;;  %v696_v27 = vld [vmem:[%s1775_s15 + $0x18] sm:$0xff]  ;;  %v709_v28 = vld [vmem:[%s1775_s15 + $0x80] sm:$0xff] }
  0xc6   : > { %586 = vmatprep.subr.bf16.mxu0 %v553_v33  ;;  %1078 = vmatprep.subr.bf16.mxu1 %v738_v2  ;;  %v710_v29 = vld [vmem:[%s1775_s15 + $0x88] sm:$0xff]  ;;  %v726_v30 = vpack.c.bf16 %v696_v27, %v695_v26  ;;  %v693_v32 = vld [vmem:[%s1775_s15] sm:$0xff]  ;;  %v661_v22 = vld [vmem:[%s1733_s7] sm:$0x3] }
  0xc7   : > { %v733_v31 = vpack.c.bf16 %v710_v29, %v709_v28  ;;  %v694_v33 = vld [vmem:[%s1775_s15 + $0x8] sm:$0xff] }
  0xc8   : > { %v725_v34 = vpack.c.bf16 %v694_v33, %v693_v32  ;;  %v675_v23 = vld [vmem:[%s509_s13] sm:$0x3] }
  0xc9   : > { %587 = vmatpush1.bf16.msra.mxu0 %v552_v38  ;;  %1079 = vmatpush3.bf16.msra.mxu1 %v730_v6  ;;  %v564_v38 = vld [vmem:[%s1731_s29] sm:$0x3]  ;;  %v680_v27 = vrot.slane %v675_v23, %v1809_v37  ;;  %s1432_s29 = smov [#allocation11]  }
  0xca   : > { %588 = vmatprep.subr.bf16.mxu0 %v551_v39  ;;  %1080 = vmatprep.subr.bf16.mxu1 %v737_v7  ;;  %v1812_v39 = vsub.s32 1, %v567_v36  ;;  %v569_v40 = vrot.slane %v564_v38, %v1809_v37  ;;  %s1322_s17 = sshll.u32 %s1432_s29, 4  ;;  %s1323_s17 = int_to_ptr.vmem [resolvable:$false] %s1322_s17 }
  0xcb   : > { %s1324_s7 = scalar_lea.vmem %s1323_s17, 256  ;;  %p1325_p3 = scmp.lt.s32.totalorder %s816_s27, %s1323_s17 }
  0xcc   : > { %v573_v41 = vrot.slane %v564_v38, %v1812_v39  ;;  %p1326_p11 = scmp.lt.s32.totalorder %s1324_s7, %s1318_s26 }
  0xcd   : > { %589 = vmatpush1.bf16.msra.mxu0 %v550_v44  ;;  %1081 = vmatpush3.bf16.msra.mxu1 %v729_v12 }
  0xce   : > { %590 = vmatprep.subr.bf16.mxu0 %v549_v45  ;;  %1082 = vmatprep.subr.bf16.mxu1 %v736_v13  ;;  %p1327_p4 = por %p1326_p11, %p1325_p3 }
  0xd0   : > { %p1328_p5 = pnand %p1327_p4, %p1321_p2 }
  0xd1   : > { %591 = vmatpush1.bf16.msra.mxu0 %v548_v48  ;;  %1083 = vmatpush3.bf16.msra.mxu1 %v728_v18 }
  0xd2   : > { %1084 = vmatprep.subr.bf16.mxu1 %v735_v19 }
  0xd4   : > { %609 = vmatmul.mubr.bf16.vlgmr.msra.gmra.mxu0 %v515_v50 }
  0xd5   : > { %1085 = vmatpush3.bf16.msra.mxu1 %v727_v24 }
  0xd6   : > { %1086 = vmatprep.subr.bf16.mxu1 %v734_v25  ;;  %v666_v25 = vrot.slane %v661_v22, %v1809_v37 }
  0xd9   : > { %1087 = vmatpush3.bf16.msra.mxu1 %v726_v30  ;;  %v670_v30 = vrot.slane %v661_v22, %v1812_v39 }
  0xda   : > { %1088 = vmatprep.subr.bf16.mxu1 %v733_v31 }
  0xdd   : > { %1089 = vmatpush3.bf16.msra.mxu1 %v725_v34  ;;  %v684_v34 = vrot.slane %v675_v23, %v1812_v39 }
 0x194   : > { %v610_v42 = vpop.f32.mrf.mxu0 }
 0x195   : > { %v611_v43 = vadd.f32 %v610_v42, %v569_v40 }
 0x196   : > { %v612_v44 = vpop.f32.mrf.mxu0 }
 0x197   : > { %v617_v45 = vrot.slane %v611_v43, 4  ;;  %v631_v46 = vmul.f32 %v611_v43, %v611_v43  ;;  %v613_v47 = vadd.f32 %v612_v44, %v573_v41  ;;  %v1063_v44 = vld [vmem:[%s512_s24] ss:$0 sm:$0xff] }
 0x198   : > { %v614_v48 = vpop.f32.mrf.mxu0 }
 0x199   : > { %v618_v49 = vadd.f32 %v617_v45, %v611_v43  ;;  %v633_v50 = vrot.slane %v631_v46, 4  ;;  %v623_v51 = vrot.slane %v613_v47, 4  ;;  %v632_v52 = vmul.f32 %v613_v47, %v613_v47 }
 0x19a   : > { %v615_v53 = vpop.f32.mrf.mxu0 }
 0x19b   : > { %v619_v54 = vrot.slane %v618_v49, 2  ;;  %v634_v55 = vadd.f32 %v633_v50, %v631_v46  ;;  %v624_v56 = vadd.f32 %v623_v51, %v613_v47  ;;  %v639_v57 = vrot.slane %v632_v52, 4 }
 0x19d   : > { %v620_v58 = vadd.f32 %v619_v54, %v618_v49  ;;  %v635_v59 = vrot.slane %v634_v55, 2  ;;  %v625_v60 = vrot.slane %v624_v56, 2  ;;  %v640_v61 = vadd.f32 %v639_v57, %v632_v52 }
 0x19f   : > { %v621_v62 = vrot.slane %v620_v58, 1  ;;  %v636_v63 = vadd.f32 %v635_v59, %v634_v55  ;;  %v626_v0 = vadd.f32 %v625_v60, %v624_v56  ;;  %v641_v1 = vrot.slane %v640_v61, 2 }
 0x1a1   : > { %v622_v2 = vadd.f32 %v621_v62, %v620_v58  ;;  %v637_v3 = vrot.slane %v636_v63, 1  ;;  %v642_v4 = vadd.f32 %v641_v1, %v640_v61  ;;  %v627_v5 = vrot.slane %v626_v0, 1 }
 0x1a3   : > { %v629_v6 = vmul.f32 0.125, %v622_v2  ;;  %v638_v7 = vadd.f32 %v637_v3, %v636_v63  ;;  %v643_v8 = vrot.slane %v642_v4, 1  ;;  %v628_v9 = vadd.f32 %v627_v5, %v626_v0 }
 0x1a5   : > { %v645_v10 = vmul.f32 0.125, %v638_v7  ;;  %v647_v11 = vmul.f32 %v629_v6, %v629_v6  ;;  %v644_v12 = vadd.f32 %v643_v8, %v642_v4  ;;  %v630_v13 = vmul.f32 0.125, %v628_v9 }
 0x1a6   : > { %v653_v24 = vsub.f32 %v611_v43, %v629_v6 }
 0x1a7   : > { %v649_v14 = vsub.f32 %v645_v10, %v647_v11  ;;  %v646_v15 = vmul.f32 0.125, %v644_v12  ;;  %v648_v16 = vmul.f32 %v630_v13, %v630_v13  ;;  %v654_v29 = vsub.f32 %v613_v47, %v630_v13 }
 0x1a9   : > { %v651_v17 = vmax.f32 %v649_v14, 0.0  ;;  %v650_v18 = vsub.f32 %v646_v15, %v648_v16 }
 0x1ab   : > { %v655_v19 = vadd.f32 1e-05, %v651_v17  ;;  %v652_v20 = vmax.f32 %v650_v18, 0.0 }
 0x1ad   : > { %1172 = vrsqrt.f32 %v655_v19  ;;  %v656_v21 = vadd.f32 1e-05, %v652_v20 }
 0x1af   : > { %1174 = vrsqrt.f32 %v656_v21 }
 0x1ba   : > { %v1173_v26 = vpop.eup %1172 }
 0x1bb   : > { %v659_v28 = vmul.f32 %v1173_v26, %v653_v24 }
 0x1bc   : > { %v1175_v31 = vpop.eup %1174 }
 0x1bd   : > { %v673_v32 = vmul.f32 %v666_v25, %v659_v28  ;;  %v660_v33 = vmul.f32 %v1175_v31, %v654_v29 }
 0x1bf   : > { %v687_v35 = vadd.f32 %v680_v27, %v673_v32  ;;  %v674_v36 = vmul.f32 %v670_v30, %v660_v33 }
 0x1c1   : > { %v688_v38 = vadd.f32 %v684_v34, %v674_v36  ;;  %v689_v40 = vmax.f32 %v687_v35, 0.0 }
 0x1c3   : > { %v690_v41 = vmax.f32 %v688_v38, 0.0  ;;  %v691_v43 = vpack.c.bf16 %v689_v40, %v689_v40 }
 0x1c5   : > { %v692_v42 = vpack.c.bf16 %v690_v41, %v690_v41 }
 0x1c7   : > { %780 = vmatprep.mubr.bf16.mxu1 %v692_v42 }
 0x1c8   : > { %781 = vmatmul.mubr.bf16.vlgmr.msra.gmra.mxu1 %v691_v43 }
 0x288   : > { %v1090_v37 = vpop.f32.mrf.mxu1 }
 0x28a   : > { %v1091_v39 = vpop.f32.mrf.mxu1 }
 0x28b   : > { %v1092_v45 = vadd.f32 %v1091_v39, %v1090_v37 }
 0x28c   : > { %v1093_v46 = vpop.f32.mrf.mxu1 }
 0x28d   : > { %v783_v47 = vadd.f32 %v1092_v45, %v1063_v44 }
 0x28e   : > { %v1094_v48 = vpop.f32.mrf.mxu1 }
 0x28f   : > { %v789_v49 = vmul.f32 %v783_v47, %v783_v47  ;;  %788 = vst [vmem:[%s498_s23] sm:$0xff] %v783_v47 }
 0x291   : > { %790 = vadd.xlane.f32.xlu0 %v789_v49 }
 0x292   : > { %1331 = shalt.err (!%p1328_p5)
}
 0x293   : > { %s1332_s15 = scalar_lea.hbm %s813_s8, 128  ;;  %s1336_s20 = scalar_lea.hbm %s1940_s1, 384 }
 0x294   : > { %p1333_p7 = scmp.ne.s32.totalorder %s813_s8, %s1332_s15  ;;  %p1337_p0 = scmp.lt.s32.totalorder %s813_s8, %s1940_s1 }
 0x295   : > { %p1338_p13 = scmp.lt.s32.totalorder %s1336_s20, %s1332_s15 }
 0x296   : > { %p1334_p8 = pnand %p1333_p7, %p1941_p6 }
 0x297   : > { %p1339_p12 = por %p1338_p13, %p1337_p0 }
 0x298   : > { %p1335_p9 = pneg %p1334_p8 }
 0x29a   : > { %p1340_p1 = pnand %p1339_p12, %p1335_p9 }
 0x29c   : > { %1343 = shalt.err (!%p1340_p1)
}
 0x29d   : > { %1106 = dma.vmem_to_hbm [thread:$0]  (%p1941_p6), %s816_s27, 128, %s813_s8, %s797_s19  }
 0x29e   : > { %s505_s12 = scalar_lea.vmem [#allocation12], %s1712_s10  ;;  %s1942_s3 = sld [smem:[#allocation29_spill]] }
 0x29f   : > { %s828_s21 = sshll.u32 %s505_s12, 4  ;;  %s802_s26 = scalar_lea.sflag [#allocation13], %s1709_s14  ;;  %s829_s21 = int_to_ptr.vmem [resolvable:$true] %s828_s21 }
 0x2a0   : > { %s1344_s29 = scalar_lea.vmem %s829_s21, 128  ;;  %s1433_s8 = smov [#allocation12]  }
 0x2a1   : > { %p1345_p10 = scmp.ne.s32.totalorder %s829_s21, %s1344_s29  ;;  %s1348_s27 = sshll.u32 %s1433_s8, 4  ;;  %s1349_s27 = int_to_ptr.vmem [resolvable:$false] %s1348_s27 }
 0x2a2   : > { %s1350_s10 = scalar_lea.vmem %s1349_s27, 256  ;;  %p1351_p11 = scmp.lt.s32.totalorder %s829_s21, %s1349_s27 }
 0x2a3   : > { %p1346_p2 = pnand %p1345_p10, %p1941_p6  ;;  %p1352_p4 = scmp.lt.s32.totalorder %s1350_s10, %s1344_s29 }
 0x2a4   : > { %s826_s11 = scalar_lea.hbm %s1942_s3, %s1066_s25 }
 0x2a5   : > { %p1347_p3 = pneg %p1346_p2  ;;  %p1353_p5 = por %p1352_p4, %p1351_p11 }
 0x2a7   : > { %p1354_p7 = pnand %p1353_p5, %p1347_p3 }
 0x31a   : > { %v791_v50 = vpop.xlane.xlu0 %790 }
 0x31b   : > { %v792_v51 = vmax.f32 %v791_v50, 1e-24 }
 0x31d   : > { %1176 = vrsqrt.f32 %v792_v51 }
 0x32a   : > { %v1177_v52 = vpop.eup %1176 }
 0x32b   : > { %v794_v53 = vmul.f32 %v1177_v52, %v783_v47 }
 0x32d   : > { %795 = vst [vmem:[%s505_s12] sm:$0xff] %v794_v53 }
 0x32e   : > { %1357 = shalt.err (!%p1354_p7)
}
 0x32f   : > { %s1358_s9 = scalar_lea.hbm %s826_s11, 128  ;;  %s1362_s19 = scalar_lea.hbm %s1942_s3, 384 }
 0x330   : > { %p1359_p8 = scmp.ne.s32.totalorder %s826_s11, %s1358_s9  ;;  %p1363_p13 = scmp.lt.s32.totalorder %s826_s11, %s1942_s3 }
 0x331   : > { %p1364_p12 = scmp.lt.s32.totalorder %s1362_s19, %s1358_s9 }
 0x332   : > { %p1360_p9 = pnand %p1359_p8, %p1941_p6 }
 0x333   : > { %p1365_p1 = por %p1364_p12, %p1363_p13 }
 0x334   : > { %p1361_p0 = pneg %p1360_p9 }
 0x336   : > { %p1366_p10 = pnand %p1365_p1, %p1361_p0 }
 0x338   : > { %1369 = shalt.err (!%p1366_p10)
}
 0x339   : > { %1107 = dma.vmem_to_hbm [thread:$0]  (%p1941_p6), %s829_s21, 128, %s826_s11, %s802_s26  }
 0x33a PF: > { %s1943_s15 = sld [smem:[#allocation21_spill]] }
 0x33b   : > { %s1944_s18 = sld [smem:[#allocation19_spill]] }
 0x33c   : > { %s1945_s16 = sld [smem:[#allocation25_spill]] }
 0x340   : > { %p1134_p2 = scmp.ge.s32.totalorder %s1943_s15, 2 }
 0x341   : > { %s840_s20 = sand.u32 1, %s1944_s18  }
 0x342   : > { %p1946_p3 = scmp.ne.s32.totalorder %s1945_s16, 0  ;;  %s841_s30 = scalar_lea.sflag [#allocation4], %s840_s20 }
 0x344   : > { %p1127_p11 = pnand %p1134_p2, %p1946_p3 }
 0x346   : > { %p1128_p4 = pneg %p1127_p11 }
 0x348   : > { %1399 = dma.done.wait (%p1128_p4), %s841_s30, 128  }
 0x349   : > { %1401 = vsyncadd (%p1128_p4), %s841_s30, 4294967168  ;;  %s850_s13 = scalar_lea.sflag [#allocation13], %s840_s20 }
 0x34a   : > { %1403 = dma.done.wait (%p1128_p4), %s850_s13, 128  }
 0x34b   : > { %1405 = vsyncadd (%p1128_p4), %s850_s13, 4294967168  ;;  %s1947_s30 = sld [smem:[#allocation22_spill]]  ;;  %s1950_s27 = smov %s1412_s28 }
 0x34c   : > { %s1948_s12 = sld [smem:[#allocation20_spill]] }
 0x34d   : > { %s1949_s29 = sld [smem:[#allocation23_spill]] }
 0x351   : > { %p31_p6 = scmp.ge.s32.totalorder %s1947_s30, 5  }
 0x352   : > { %s1951_s28 = smov %s1948_s12 }
 0x353   :  { %33 = sbr.rel (!%p31_p6) target bundleno = 16 (0x10), region = 164 }
 0x358   :  { %855 = vsyncpa [#allocation3], 1 }
 0x359   :  { %857 = vsyncpa [#allocation3 + $0x1], 1 }
 0x35a   :  { %858 = vsyncpa [#allocation6], 1 }
 0x35b   :  { %860 = vsyncpa [#allocation6 + $0x1], 1 }
 0x35c   :  { %861 = vsyncpa [#allocation9], 1 }
 0x35d   :  { %863 = vsyncpa [#allocation9 + $0x1], 1 }
 0x35e   :  { %864 = vsyncpa [#allocation4], 1 }
 0x35f   :  { %866 = vsyncpa [#allocation4 + $0x1], 1 }
 0x360   :  { %867 = vsyncpa [#allocation13], 1 }
 0x361   :  { %869 = vsyncpa [#allocation13 + $0x1], 1 }

</bundles_post_ra>
